<compile_context>
chip_gen: v5e
topology: v5e:2x2
jax: 0.10.0
libtpu: 0.0.40
codegen_flags: <defaults>
</compile_context>

<pallas_src>
import functools

import jax
import jax.numpy as jnp
from jax import lax
from jax.experimental import pallas as pl
from jax.experimental.pallas import tpu as pltpu

N_CLASSES = 5
C_PAD = 128            # lane-dense class dimension (one full vreg lane width)
NEG = -1e30            # finite "-inf" bias for padded classes (keeps 0*NEG finite)
DEFAULT_TILE_B = 512   # >=512 rows ~ HBM roofline; well under v7x VMEM budget


def _round_up(a, m):
    return (a + m - 1) // m * m


def _logits(x_ref, w_ref, b_ref):
    # MXU-native contraction of x's K axis against W's K axis (trans_b form),
    # no materialized W transpose. Result: (TILE_B, C_PAD) f32.
    return lax.dot_general(
        x_ref[...], w_ref[...],
        dimension_numbers=(((1,), (1,)), ((), ())),
        preferred_element_type=jnp.float32) + b_ref[...]


def _softmax_kernel(x_ref, w_ref, b_ref, probs_ref):
    logits = _logits(x_ref, w_ref, b_ref)                    # (TILE_B, C_PAD)
    m = jnp.max(logits, axis=-1, keepdims=True)
    e = jnp.exp(logits - m)                                  # padded cols -> 0
    denom = jnp.sum(e, axis=-1, keepdims=True)
    # EUP reciprocal: frees VALU slots, essentially free accuracy-wise.
    probs_ref[...] = (e * pl.reciprocal(denom, approx=True)).astype(probs_ref.dtype)


def _fused_kernel(x_ref, w_ref, b_ref, y_ref, probs_ref, loss_ref, *, tile_b, batch):
    i = pl.program_id(0)

    logits = _logits(x_ref, w_ref, b_ref)                    # (TILE_B, C_PAD)
    m = jnp.max(logits, axis=-1, keepdims=True)
    e = jnp.exp(logits - m)
    denom = jnp.sum(e, axis=-1, keepdims=True)
    probs_ref[...] = (e * pl.reciprocal(denom, approx=True)).astype(probs_ref.dtype)

    # ---- cross entropy, reusing the same logits (single pallas_call) ----
    lse = jnp.log(denom) + m                                 # (TILE_B, 1)
    classes = lax.broadcasted_iota(jnp.int32, logits.shape, 1)
    onehot = (classes == y_ref[...]).astype(jnp.float32)     # y < 5, pads never hit
    target = jnp.sum(logits * onehot, axis=-1, keepdims=True)

    # Mask ragged/padded batch rows via global row index (batch is static).
    rows = lax.broadcasted_iota(jnp.int32, (tile_b, 1), 0) + i * tile_b
    per_row = jnp.where(rows < batch, lse - target, 0.0)     # (TILE_B, 1)

    @pl.when(i == 0)
    def _init():
        loss_ref[...] = jnp.zeros_like(loss_ref)

    loss_ref[...] = loss_ref[...] + jnp.sum(per_row, axis=0, keepdims=True)

    @pl.when(i == pl.num_programs(0) - 1)
    def _finalize():
        loss_ref[...] = loss_ref[...] * jnp.float32(1.0 / batch)


def _pad_params(w, b):
    # Pad class dim to a full 128-lane width; padded classes get bias = NEG so
    # they contribute 0 to softmax / logsumexp.
    w_pad = jnp.zeros((C_PAD, w.shape[1]), jnp.float32).at[:N_CLASSES].set(
        w.astype(jnp.float32))
    b_pad = jnp.full((1, C_PAD), NEG, jnp.float32).at[0, :N_CLASSES].set(
        b.astype(jnp.float32))
    return w_pad, b_pad


def _pad_batch(arr, rows):
    pad = rows - arr.shape[0]
    if pad == 0:
        return arr
    return jnp.pad(arr, [(0, pad)] + [(0, 0)] * (arr.ndim - 1))


def _tiling(batch, tile_b):
    tile_b = min(tile_b, _round_up(batch, 8))
    b_pad = _round_up(batch, tile_b)
    return tile_b, b_pad, b_pad // tile_b


def torch_model_forward(x, w, b, tile_b=DEFAULT_TILE_B):
    """TorchModel.forward(x) with y=None -> softmax(linear(x), dim=1)."""
    B, F = x.shape
    tile_b, b_pad_rows, grid = _tiling(B, tile_b)
    w_pad, b_pad = _pad_params(w, b)
    x_p = _pad_batch(x.astype(jnp.float32), b_pad_rows)

    probs = pl.pallas_call(
        _softmax_kernel,
        out_shape=jax.ShapeDtypeStruct((b_pad_rows, C_PAD), jnp.float32),
        grid_spec=pltpu.PrefetchScalarGridSpec(
            num_scalar_prefetch=0,
            grid=(grid,),
            in_specs=[
                pl.BlockSpec((tile_b, F), lambda i: (i, 0)),     # stream x
                pl.BlockSpec((C_PAD, F), lambda i: (0, 0)),      # W resident
                pl.BlockSpec((1, C_PAD), lambda i: (0, 0)),      # bias resident
            ],
            out_specs=pl.BlockSpec((tile_b, C_PAD), lambda i: (i, 0)),
        ),
        compiler_params=pltpu.CompilerParams(
            dimension_semantics=("parallel",)),  # batch axis -> both v7x TCs
    )(x_p, w_pad, b_pad)
    return probs[:B, :N_CLASSES]


def torch_model_forward_and_loss(x, y, w, b, tile_b=DEFAULT_TILE_B):
    """Single fused pallas_call: returns (softmax probs, mean cross-entropy)."""
    B, F = x.shape
    tile_b, b_pad_rows, grid = _tiling(B, tile_b)
    w_pad, b_pad = _pad_params(w, b)
    x_p = _pad_batch(x.astype(jnp.float32), b_pad_rows)
    y_p = _pad_batch(y.reshape(-1, 1).astype(jnp.int32), b_pad_rows)

    kernel = functools.partial(_fused_kernel, tile_b=tile_b, batch=B)
    probs, loss = pl.pallas_call(
        kernel,
        out_shape=(jax.ShapeDtypeStruct((b_pad_rows, C_PAD), jnp.float32),
                   jax.ShapeDtypeStruct((1, 1), jnp.float32)),
        grid_spec=pltpu.PrefetchScalarGridSpec(
            num_scalar_prefetch=0,
            grid=(grid,),
            in_specs=[
                pl.BlockSpec((tile_b, F), lambda i: (i, 0)),     # stream x
                pl.BlockSpec((C_PAD, F), lambda i: (0, 0)),      # W resident
                pl.BlockSpec((1, C_PAD), lambda i: (0, 0)),      # bias resident
                pl.BlockSpec((tile_b, 1), lambda i: (i, 0)),     # stream labels
            ],
            out_specs=[
                pl.BlockSpec((tile_b, C_PAD), lambda i: (i, 0)),
                pl.BlockSpec((1, 1), lambda i: (0, 0)),          # loss accumulator
            ],
        ),
        compiler_params=pltpu.CompilerParams(
            dimension_semantics=("arbitrary",)),  # loss carried across steps
    )(x_p, w_pad, b_pad, y_p)
    return probs[:B, :N_CLASSES], loss[0, 0]


def torch_model_loss(x, y, w, b, tile_b=DEFAULT_TILE_B):
    """TorchModel.forward(x, y) -> cross_entropy(linear(x), y) (mean reduction)."""
    return torch_model_forward_and_loss(x, y, w, b, tile_b)[1]


def _reference(x, y, w, b):
    logits = x @ w.T + b
    probs = jax.nn.softmax(logits, axis=1)
    loss = jnp.mean(jax.nn.logsumexp(logits, axis=1)
                    - jnp.take_along_axis(logits, y[:, None], axis=1)[:, 0])
    return probs, loss


if __name__ == "__main__":
    key = jax.random.PRNGKey(0)
    kx, kw, kb, ky, kx2, ky2 = jax.random.split(key, 6)

    B, INPUT_SIZE = 8, 32

    # nn.Linear(input_size, 5) parameters
    w = jax.random.normal(kw, (N_CLASSES, INPUT_SIZE), dtype=jnp.float32) * 0.1
    b = jax.random.normal(kb, (N_CLASSES,), dtype=jnp.float32) * 0.1

    # small deterministic batch
    x = jax.random.normal(kx, (B, INPUT_SIZE), dtype=jnp.float32)
    y = jax.random.randint(ky, (B,), 0, N_CLASSES, dtype=jnp.int32)

    # inference path: softmax(linear(x), dim=1)
    probs = jax.block_until_ready(torch_model_forward(x, w, b))
    # fused path: one pallas_call emits probs and the mean CE loss
    probs_f, loss = torch_model_forward_and_loss(x, y, w, b)
    probs_f = jax.block_until_ready(probs_f)
    loss = jax.block_until_ready(loss)
    loss_only = jax.block_until_ready(torch_model_loss(x, y, w, b))

    probs_ref, loss_ref = _reference(x, y, w, b)
    # probs use the EUP approximate reciprocal -> slightly looser tolerance
    assert probs.shape == (B, N_CLASSES)
    assert jnp.allclose(probs, probs_ref, atol=5e-3), "softmax mismatch"
    assert jnp.allclose(probs_f, probs_ref, atol=5e-3), "fused softmax mismatch"
    assert jnp.allclose(loss, loss_ref, atol=5e-4), "fused loss mismatch"
    assert jnp.allclose(loss_only, loss_ref, atol=5e-4), "loss mismatch"

    # larger, ragged batch: exercises the batch grid (2 steps of TILE_B=512),
    # resident-W / resident-loss accumulator, and padded-row masking.
    B2 = 777
    x2 = jax.random.normal(kx2, (B2, INPUT_SIZE), dtype=jnp.float32)
    y2 = jax.random.randint(ky2, (B2,), 0, N_CLASSES, dtype=jnp.int32)
    probs2, loss2 = torch_model_forward_and_loss(x2, y2, w, b)
    probs2 = jax.block_until_ready(probs2)
    loss2 = jax.block_until_ready(loss2)
    probs2_ref, loss2_ref = _reference(x2, y2, w, b)
    assert probs2.shape == (B2, N_CLASSES)
    assert jnp.allclose(probs2, probs2_ref, atol=5e-3), "tiled softmax mismatch"
    assert jnp.allclose(loss2, loss2_ref, atol=5e-4), "tiled loss mismatch"

    print("KERNEL_OK")
</pallas_src>

<mosaic_0001>
module attributes {stable_mosaic.version = 11 : i64} {
  func.func @_softmax_kernel(%arg0: i32, %arg1: memref<8x32xf32, #tpu.memory_space<vmem>>, %arg2: memref<128x32xf32, #tpu.memory_space<vmem>>, %arg3: memref<1x128xf32, #tpu.memory_space<vmem>>, %arg4: memref<8x128xf32, #tpu.memory_space<vmem>>) attributes {dimension_semantics = [#tpu.dimension_semantics<parallel>], iteration_bounds = array<i64: 1>, scalar_prefetch = 0 : i64, scratch_operands = 0 : i64, tpu.core_type = #tpu.core_type<tc>, window_params = [{transform_indices = @transform_0, window_bounds = array<i64: 8, 32>}, {pipeline_mode = #tpu.pipeline_mode<synchronous>, transform_indices = @transform_1, window_bounds = array<i64: 128, 32>}, {pipeline_mode = #tpu.pipeline_mode<synchronous>, transform_indices = @transform_2, window_bounds = array<i64: 1, 128>}, {transform_indices = @transform_3, window_bounds = array<i64: 8, 128>}]} {
    %c0 = arith.constant 0 : index
    %c0_0 = arith.constant 0 : index
    %0 = vector.load %arg1[%c0, %c0_0] : memref<8x32xf32, #tpu.memory_space<vmem>>, vector<8x32xf32>
    %c0_1 = arith.constant 0 : index
    %c0_2 = arith.constant 0 : index
    %1 = vector.load %arg2[%c0_1, %c0_2] : memref<128x32xf32, #tpu.memory_space<vmem>>, vector<128x32xf32>
    %cst = arith.constant dense<0.000000e+00> : vector<8x128xf32>
    %2 = tpu.matmul %0, %1, %cst {dimension_numbers = #tpu.dot_dimension_numbers<[1], [1], [0], [0], [0, 0, 1, 0], [], []>} : vector<8x32xf32>, vector<128x32xf32>, vector<8x128xf32> -> vector<8x128xf32>
    %c0_3 = arith.constant 0 : index
    %c0_4 = arith.constant 0 : index
    %3 = vector.load %arg3[%c0_3, %c0_4] : memref<1x128xf32, #tpu.memory_space<vmem>>, vector<1x128xf32>
    %4 = vector.broadcast %3 : vector<1x128xf32> to vector<8x128xf32>
    %5 = arith.addf %2, %4 : vector<8x128xf32>
    %cst_5 = arith.constant dense<0xFF800000> : vector<8xf32>
    %6 = vector.multi_reduction <maximumf>, %5, %cst_5 [1] : vector<8x128xf32> to vector<8xf32>
    %7 = vector.shape_cast %6 : vector<8xf32> to vector<8x1xf32>
    %8 = vector.broadcast %7 : vector<8x1xf32> to vector<8x128xf32>
    %9 = arith.subf %5, %8 : vector<8x128xf32>
    %10 = math.exp %9 : vector<8x128xf32>
    %cst_6 = arith.constant dense<0.000000e+00> : vector<8xf32>
    %11 = vector.multi_reduction <add>, %10, %cst_6 [1] : vector<8x128xf32> to vector<8xf32>
    %12 = vector.shape_cast %11 : vector<8xf32> to vector<8x1xf32>
    %13 = tpu.reciprocal %12 {approx = true} : vector<8x1xf32> -> vector<8x1xf32>
    %14 = vector.broadcast %13 : vector<8x1xf32> to vector<8x128xf32>
    %15 = arith.mulf %10, %14 : vector<8x128xf32>
    %c0_7 = arith.constant 0 : index
    %c0_8 = arith.constant 0 : index
    %16 = vector.load %arg4[%c0_7, %c0_8] : memref<8x128xf32, #tpu.memory_space<vmem>>, vector<8x128xf32>
    tpu.vector_store %arg4[%c0_7, %c0_8], %15 {strides = array<i32>} : memref<8x128xf32, #tpu.memory_space<vmem>>, vector<8x128xf32>,
    return
  }
  func.func @transform_0(%arg0: i32) -> (i32, i32) {
    %c0_i32 = arith.constant 0 : i32
    %c0_i32_0 = arith.constant 0 : i32
    return %arg0, %c0_i32 : i32, i32
  }
  func.func @transform_1(%arg0: i32) -> (i32, i32) {
    %c0_i32 = arith.constant 0 : i32
    %c0_i32_0 = arith.constant 0 : i32
    %c0_i32_1 = arith.constant 0 : i32
    return %c0_i32, %c0_i32_0 : i32, i32
  }
  func.func @transform_2(%arg0: i32) -> (i32, i32) {
    %c0_i32 = arith.constant 0 : i32
    %c0_i32_0 = arith.constant 0 : i32
    %c0_i32_1 = arith.constant 0 : i32
    return %c0_i32, %c0_i32_0 : i32, i32
  }
  func.func @transform_3(%arg0: i32) -> (i32, i32) {
    %c0_i32 = arith.constant 0 : i32
    %c0_i32_0 = arith.constant 0 : i32
    return %arg0, %c0_i32 : i32, i32
  }
}

</mosaic_0001>

<bundles_post_ra>
// kernel: tpu_custom_call.1
= control target key start
LH: loop header
LB: loop body
LE: loop exit
PB: predicated region body
PF: predicated region fallthrough
CT: control target
= control target key end

     0   :  { %vm36_vm0 = vcmask 261120   ;;  %s278_s0 = inlined_call_operand.vmem [shape: f32[8,32], index: 0, kind: input, shape index: {}]   ;;  %s279_s1 = inlined_call_operand.vmem [shape: f32[128,32], index: 1, kind: input, shape index: {}]   ;;  %s280_s2 = inlined_call_operand.vmem [shape: f32[1,128], index: 2, kind: input, shape index: {}]   ;;  %s281_s3 = inlined_call_operand.hbm [shape: f32[8,128], index: 3, kind: output, shape index: {}]  }
   0x1   :  { %v31_v0 = vld [vmem:[%s279_s1 + $0x78] sm:$0xff]  ;;  %v30_v1 = vld [vmem:[%s279_s1 + $0x70] sm:$0xff] }
   0x2   :  { %134 = vmatpush.xpose.msk.msra.mxu0 %vm36_vm0, %v31_v0 }
   0x3   :  { %8 = vsyncpa [#allocation3], 0  ;;  %v29_v2 = vld [vmem:[%s279_s1 + $0x68] sm:$0xff]  ;;  %v28_v3 = vld [vmem:[%s279_s1 + $0x60] sm:$0xff]  ;;  %s125_s23 = sshll.u32 %s281_s3, 4  ;;  %s126_s23 = int_to_ptr.hbm [resolvable:$true] %s125_s23 }
   0x4   :  { %v27_v4 = vld [vmem:[%s279_s1 + $0x58] sm:$0xff]  ;;  %v26_v5 = vld [vmem:[%s279_s1 + $0x50] sm:$0xff]  ;;  %v25_v6 = vld [vmem:[%s279_s1 + $0x48] sm:$0xff] }
   0x5   :  { %v24_v7 = vld [vmem:[%s279_s1 + $0x40] sm:$0xff]  ;;  %v23_v8 = vld [vmem:[%s279_s1 + $0x38] sm:$0xff]  ;;  %v22_v9 = vld [vmem:[%s279_s1 + $0x30] sm:$0xff] }
   0x6   :  { %135 = vmatpush.xpose.msk.msra.mxu0 %vm36_vm0, %v30_v1  ;;  %v21_v10 = vld [vmem:[%s279_s1 + $0x28] sm:$0xff]  ;;  %v20_v11 = vld [vmem:[%s279_s1 + $0x20] sm:$0xff]  ;;  %v19_v12 = vld [vmem:[%s279_s1 + $0x18] sm:$0xff] }
   0x7   :  { %v18_v13 = vld [vmem:[%s279_s1 + $0x10] sm:$0xff]  ;;  %v17_v14 = vld [vmem:[%s279_s1 + $0x8] sm:$0xff]  ;;  %v16_v15 = vld [vmem:[%s279_s1] sm:$0xff]  ;;  %s183_s1 = smov [#allocation2]  }
   0x8   :  { %v15_v16 = vld [vmem:[%s278_s0] sm:$0xff]  ;;  %s123_s21 = sshll.u32 %s183_s1, 4  ;;  %s124_s21 = int_to_ptr.vmem [resolvable:$true] %s123_s21 }
   0x9   :  { %v152_v17 = vld [vmem:[%s280_s2] ss:$0 sm:$0xff] }
   0xa   :  { %136 = vmatpush.xpose.msk.msra.mxu0 %vm36_vm0, %v29_v2 }
   0xe   :  { %137 = vmatpush.xpose.msk.msra.mxu0 %vm36_vm0, %v28_v3 }
  0x12   :  { %138 = vmatpush.xpose.msk.msra.mxu0 %vm36_vm0, %v27_v4 }
  0x16   :  { %139 = vmatpush.xpose.msk.msra.mxu0 %vm36_vm0, %v26_v5 }
  0x1a   :  { %140 = vmatpush.xpose.msk.msra.mxu0 %vm36_vm0, %v25_v6 }
  0x1e   :  { %141 = vmatpush.xpose.msk.msra.mxu0 %vm36_vm0, %v24_v7 }
  0x22   :  { %142 = vmatpush.xpose.msk.msra.mxu0 %vm36_vm0, %v23_v8 }
  0x26   :  { %143 = vmatpush.xpose.msk.msra.mxu0 %vm36_vm0, %v22_v9 }
  0x2a   :  { %144 = vmatpush.xpose.msk.msra.mxu0 %vm36_vm0, %v21_v10 }
  0x2e   :  { %145 = vmatpush.xpose.msk.msra.mxu0 %vm36_vm0, %v20_v11 }
  0x32   :  { %146 = vmatpush.xpose.msk.msra.mxu0 %vm36_vm0, %v19_v12 }
  0x36   :  { %147 = vmatpush.xpose.msk.msra.mxu0 %vm36_vm0, %v18_v13 }
  0x3a   :  { %148 = vmatpush.xpose.msk.msra.mxu0 %vm36_vm0, %v17_v14 }
  0x3e   :  { %149 = vmatpush.xpose.msk.msra.mxu0 %vm36_vm0, %v16_v15 }
  0x41   :  { %150 = vmatmul.msk.f32.vlgmr.msra.gmra.mxu0 %vm36_vm0, %v15_v16 }
  0xbe   :  { %v105_v18 = vpop.f32.mrf.mxu0 }
  0xbf   :  { %v106_v19 = vadd.f32 %v152_v17, %v105_v18 }
  0xc1   :  { %108 = vmax.xlane.f32.xlu0 %v106_v19 }
 0x134   :  { %v109_v20 = vpop.xlane.xlu0 %108 }
 0x135   :  { %v110_v21 = vsub.f32 %v106_v19, %v109_v20 }
 0x137   :  { %v111_v22 = vmul.f32 1.442695, %v110_v21 }
 0x139   :  { %153 = vpow2.f32 %v111_v22 }
 0x13f   :  { %v154_v23 = vpop.eup %153 }
 0x140   :  { %113 = vadd.xlane.f32.xlu0 %v154_v23 }
 0x1b3   :  { %v114_v24 = vpop.xlane.xlu0 %113 }
 0x1b4   :  { %155 = vrcp.f32 %v114_v24 }
 0x1ba   :  { %v156_v25 = vpop.eup %155 }
 0x1bb   :  { %v116_v26 = vmul.f32 %v156_v25, %v154_v23 }
 0x1bd   :  { %117 = vst [vmem:[#allocation2] sm:$0xff] %v116_v26 }
 0x1be   :  { %128 = dma.vmem_to_hbm [thread:$0]  %s124_s21, 128, %s126_s23, [#allocation3]  }
 0x1bf   :  { %181 = dma.done.wait [#allocation3], 128  }
 0x1c0   :  { %182 = vsyncadd [#allocation3], 4294967168 }
 0x1c1   :  { %133 = vsyncpa [#allocation3], 1 }

</bundles_post_ra>
